<compile_context>
chip_gen: v5e
topology: v5e:2x2
jax: 0.10.0
libtpu: 0.0.40
codegen_flags: <defaults>
</compile_context>

<pallas_src>
import functools

import jax
import jax.numpy as jnp
from jax.experimental import pallas as pl
from jax.experimental.pallas import tpu as pltpu


def _round_up(x, m):
    return ((x + m - 1) // m) * m


# --------------------------------------------------------------------------
# Kernel 1: fused Q/K/V projection over the (padded, concatenated) batch.
# --------------------------------------------------------------------------
def _qkv_proj_kernel(x_ref, wq_ref, bq_ref, wk_ref, bk_ref, wv_ref, bv_ref,
                     q_ref, k_ref, v_ref):
    x = x_ref[...]                                     # (block, D) bf16

    def proj(w_ref, b_ref, o_ref):
        y = jnp.dot(x, w_ref[...],
                    preferred_element_type=jnp.float32) + b_ref[...]
        o_ref[...] = y.astype(o_ref.dtype)             # store bf16

    proj(wq_ref, bq_ref, q_ref)
    proj(wk_ref, bk_ref, k_ref)
    proj(wv_ref, bv_ref, v_ref)


# --------------------------------------------------------------------------
# Kernel 2: flash-style attention over batch rows + fuse_embed + LeakyReLU.
# --------------------------------------------------------------------------
def _attn_fuse_kernel(nvalid_ref, q_ref, k_ref, v_ref, wf_ref, bf_ref,
                      out_ref, m_sc, l_sc, acc_sc):
    j = pl.program_id(1)
    nk = pl.num_programs(1)
    block_kv = k_ref.shape[0]

    @pl.when(j == 0)
    def _init():
        m_sc[...] = jnp.full(m_sc.shape, -jnp.inf, dtype=m_sc.dtype)
        l_sc[...] = jnp.zeros(l_sc.shape, dtype=l_sc.dtype)
        acc_sc[...] = jnp.zeros(acc_sc.shape, dtype=acc_sc.dtype)

    # Attention scores over batch rows (module has no 1/sqrt(d) scaling).
    # Contract last dims of q and k directly: no k.T is ever materialized.
    s = jax.lax.dot_general(
        q_ref[...], k_ref[...],
        dimension_numbers=(((1,), (1,)), ((), ())),
        preferred_element_type=jnp.float32)            # (block_q, block_kv) f32

    # Tail-key mask as a (1, block_kv) additive bias row (0 for valid keys,
    # -1e30 for batch padding).  All-zero for non-tail tiles; one VPU pass.
    key_idx = j * block_kv + jax.lax.broadcasted_iota(jnp.int32, (1, block_kv), 1)
    s = s + jnp.where(key_idx < nvalid_ref[0],
                      jnp.float32(0.0), jnp.float32(-1e30))

    # Online softmax update (f32 statistics).
    m_prev = m_sc[...]
    m_new = jnp.maximum(m_prev, jnp.max(s, axis=-1, keepdims=True))
    alpha = jnp.exp(m_prev - m_new)
    p = jnp.exp(s - m_new)
    l_sc[...] = alpha * l_sc[...] + jnp.sum(p, axis=-1, keepdims=True)
    acc_sc[...] = alpha * acc_sc[...] + jnp.dot(
        p.astype(v_ref.dtype), v_ref[...], preferred_element_type=jnp.float32)
    m_sc[...] = m_new

    @pl.when(j == nk - 1)
    def _finalize():
        inv_l = pl.reciprocal(l_sc[...], approx=True)          # EUP, off VALU path
        weighted = acc_sc[...] * inv_l
        y = jnp.dot(weighted.astype(wf_ref.dtype), wf_ref[...],
                    preferred_element_type=jnp.float32) + bf_ref[...]
        out_ref[...] = jnp.maximum(y, 0.2 * y).astype(out_ref.dtype)  # LeakyReLU


# --------------------------------------------------------------------------
# Wrapper.
# --------------------------------------------------------------------------
def attention_fuse_embeddings(e1, e2, e3, params, *, block_q=None, block_kv=None):
    """params: Wq/Wk/Wv/Wf are torch-style Linear weights (D, D); bq/bk/bv/bf (D,)."""
    d1, d2, d3 = e1.shape[-1], e2.shape[-1], e3.shape[-1]
    D = d1 + d2 + d3
    B = e1.shape[0]
    B8 = _round_up(B, 8)

    # Tile-size selection.
    if block_q is None:
        # Default 256, but cap so the "parallel" grid axis has >= 2 tiles when
        # the batch allows it (v7x: both TensorCores get work; no-op on v5e/v6e).
        block_q = min(256, _round_up(pl.cdiv(B, 2), 8))
    block_q = max(8, min(_round_up(block_q, 8), B8))
    if block_kv is None:
        block_kv = 1024                      # fewer kv steps => less per-step overhead
    block_kv = max(block_q, min(_round_up(block_kv, 8), B8))
    block_kv = _round_up(block_kv, block_kv and block_q)   # kv tile = multiple of q tile
    B_pad = _round_up(B, block_kv)
    nb_q, nb_kv = B_pad // block_q, B_pad // block_kv

    # One lane-dense concat (B, D) in the wrapper; bf16 MXU feed; zero-pad rows.
    x = jnp.concatenate([e1, e2, e3], axis=-1).astype(jnp.float32)
    if B_pad != B:
        x = jnp.pad(x, ((0, B_pad - B), (0, 0)))
    x = x.astype(jnp.bfloat16)

    def wt(name):   # torch Linear weight (out, in) -> (in, out), bf16 MXU feed
        return params[name].astype(jnp.float32).T.astype(jnp.bfloat16)

    def bias2d(name):  # (1, D) f32, added after f32 accumulation
        return params[name].astype(jnp.float32).reshape(1, D)

    wq_t, wk_t, wv_t, wf_t = wt("Wq"), wt("Wk"), wt("Wv"), wt("Wf")
    bq, bk, bv, bf = bias2d("bq"), bias2d("bk"), bias2d("bv"), bias2d("bf")

    # ---- kernel 1: Q/K/V projection for the whole padded batch (bf16 out) ----
    row_spec = pl.BlockSpec((block_kv, D), lambda i: (i, 0))
    w_spec = pl.BlockSpec((D, D), lambda i: (0, 0))
    b_spec = pl.BlockSpec((1, D), lambda i: (0, 0))

    q_all, k_all, v_all = pl.pallas_call(
        _qkv_proj_kernel,
        out_shape=tuple(jax.ShapeDtypeStruct((B_pad, D), jnp.bfloat16)
                        for _ in range(3)),
        grid=(B_pad // block_kv,),
        in_specs=[row_spec, w_spec, b_spec, w_spec, b_spec, w_spec, b_spec],
        out_specs=(row_spec, row_spec, row_spec),
        compiler_params=pltpu.CompilerParams(
            dimension_semantics=("parallel",)),
    )(x, wq_t, bq, wk_t, bk, wv_t, bv)

    # ---- kernel 2: flash attention + fuse_embed Linear + LeakyReLU ----
    nvalid = jnp.array([B], dtype=jnp.int32)

    out = pl.pallas_call(
        _attn_fuse_kernel,
        out_shape=jax.ShapeDtypeStruct((B_pad, D), jnp.float32),
        grid=(nb_q, nb_kv),
        in_specs=[
            pl.BlockSpec(memory_space=pltpu.MemorySpace.SMEM),     # valid batch len
            pl.BlockSpec((block_q, D), lambda i, j: (i, 0)),       # q  (resident over j)
            pl.BlockSpec((block_kv, D), lambda i, j: (j, 0)),      # k  (streamed)
            pl.BlockSpec((block_kv, D), lambda i, j: (j, 0)),      # v  (streamed)
            pl.BlockSpec((D, D), lambda i, j: (0, 0)),             # Wf^T (resident)
            pl.BlockSpec((1, D), lambda i, j: (0, 0)),             # bf   (resident)
        ],
        out_specs=pl.BlockSpec((block_q, D), lambda i, j: (i, 0)),
        scratch_shapes=[
            pltpu.VMEM((block_q, 1), jnp.float32),   # running max m
            pltpu.VMEM((block_q, 1), jnp.float32),   # running sum l
            pltpu.VMEM((block_q, D), jnp.float32),   # output accumulator
        ],
        compiler_params=pltpu.CompilerParams(
            dimension_semantics=("parallel", "arbitrary")),
    )(nvalid, q_all, k_all, v_all, wf_t, bf)

    return out[:B]


# --------------------------------------------------------------------------
# References.
# --------------------------------------------------------------------------
def reference_f32(e1, e2, e3, params):
    x = jnp.concatenate([e1, e2, e3], axis=-1)
    q = x @ params["Wq"].T + params["bq"]
    k = x @ params["Wk"].T + params["bk"]
    v = x @ params["Wv"].T + params["bv"]
    probs = jax.nn.softmax(q @ k.T, axis=-1)
    y = (probs @ v) @ params["Wf"].T + params["bf"]
    return jnp.where(y > 0, y, 0.2 * y)


def reference_bf16_feeds(e1, e2, e3, params):
    # Mirrors the kernel's numerics: bf16 MXU operands, f32 accumulation.
    r = lambda a: a.astype(jnp.bfloat16).astype(jnp.float32)
    x = r(jnp.concatenate([e1, e2, e3], axis=-1))
    q = r(x @ r(params["Wq"].T) + params["bq"])
    k = r(x @ r(params["Wk"].T) + params["bk"])
    v = r(x @ r(params["Wv"].T) + params["bv"])
    probs = jax.nn.softmax(q @ k.T, axis=-1)
    w = r(probs) @ v
    y = r(w) @ r(params["Wf"].T) + params["bf"]
    return jnp.where(y > 0, y, 0.2 * y)


if __name__ == "__main__":
    key = jax.random.PRNGKey(0)
    keys = jax.random.split(key, 11)

    # embed_dim1=16, embed_dim2=8, embed_dim3=8 -> embed_dim=32 ; batch=20
    d1, d2, d3, B = 16, 8, 8, 20
    D = d1 + d2 + d3

    e1 = jax.random.normal(keys[0], (B, d1), dtype=jnp.float32)
    e2 = jax.random.normal(keys[1], (B, d2), dtype=jnp.float32)
    e3 = jax.random.normal(keys[2], (B, d3), dtype=jnp.float32)

    bound = 1.0 / (D ** 0.5)

    def linear_params(kw, kb):
        W = jax.random.uniform(kw, (D, D), minval=-bound, maxval=bound,
                               dtype=jnp.float32)
        b = jax.random.uniform(kb, (D,), minval=-bound, maxval=bound,
                               dtype=jnp.float32)
        return W, b

    Wq, bq_p = linear_params(keys[3], keys[4])
    Wk, bk_p = linear_params(keys[5], keys[6])
    Wv, bv_p = linear_params(keys[7], keys[8])
    Wf, bf_p = linear_params(keys[9], keys[10])
    params = dict(Wq=Wq, bq=bq_p, Wk=Wk, bk=bk_p, Wv=Wv, bv=bv_p, Wf=Wf, bf=bf_p)

    # block_q=8 / block_kv=16 on B=20 -> B_pad=32, grid=(4, 2): exercises batch
    # tiling, online-softmax accumulation across kv tiles, and tail-key masking.
    out = attention_fuse_embeddings(e1, e2, e3, params, block_q=8, block_kv=16)
    out = jax.block_until_ready(out)
    assert out.shape == (B, D)

    ref_bf = reference_bf16_feeds(e1, e2, e3, params)
    ref_f32 = reference_f32(e1, e2, e3, params)

    # Tight check vs a reference with matching (bf16-feed, f32-accumulate)
    # numerics; looser check vs the pure-f32 PyTorch-equivalent reference
    # (bf16 MXU feeds make exact f32 parity impossible by design).
    assert jnp.allclose(out, ref_bf, atol=2e-2, rtol=2e-2), \
        float(jnp.max(jnp.abs(out - ref_bf)))
    assert jnp.allclose(out, ref_f32, atol=6e-2, rtol=6e-2), \
        float(jnp.max(jnp.abs(out - ref_f32)))

    # Also exercise the default (auto-selected) tiling path.
    out2 = jax.block_until_ready(attention_fuse_embeddings(e1, e2, e3, params))
    assert jnp.allclose(out2, ref_bf, atol=2e-2, rtol=2e-2), \
        float(jnp.max(jnp.abs(out2 - ref_bf)))

    print("KERNEL_OK")
</pallas_src>

<mosaic_0001>
module attributes {stable_mosaic.version = 11 : i64} {
  func.func @_qkv_proj_kernel(%arg0: i32, %arg1: memref<16x32xbf16, #tpu.memory_space<vmem>>, %arg2: memref<32x32xbf16, #tpu.memory_space<vmem>>, %arg3: memref<1x32xf32, #tpu.memory_space<vmem>>, %arg4: memref<32x32xbf16, #tpu.memory_space<vmem>>, %arg5: memref<1x32xf32, #tpu.memory_space<vmem>>, %arg6: memref<32x32xbf16, #tpu.memory_space<vmem>>, %arg7: memref<1x32xf32, #tpu.memory_space<vmem>>, %arg8: memref<16x32xbf16, #tpu.memory_space<vmem>>, %arg9: memref<16x32xbf16, #tpu.memory_space<vmem>>, %arg10: memref<16x32xbf16, #tpu.memory_space<vmem>>) attributes {dimension_semantics = [#tpu.dimension_semantics<parallel>], iteration_bounds = array<i64: 2>, scalar_prefetch = 0 : i64, scratch_operands = 0 : i64, tpu.core_type = #tpu.core_type<tc>, window_params = [{transform_indices = @transform_0, window_bounds = array<i64: 16, 32>}, {pipeline_mode = #tpu.pipeline_mode<synchronous>, transform_indices = @transform_1, window_bounds = array<i64: 32, 32>}, {pipeline_mode = #tpu.pipeline_mode<synchronous>, transform_indices = @transform_2, window_bounds = array<i64: 1, 32>}, {pipeline_mode = #tpu.pipeline_mode<synchronous>, transform_indices = @transform_3, window_bounds = array<i64: 32, 32>}, {pipeline_mode = #tpu.pipeline_mode<synchronous>, transform_indices = @transform_4, window_bounds = array<i64: 1, 32>}, {pipeline_mode = #tpu.pipeline_mode<synchronous>, transform_indices = @transform_5, window_bounds = array<i64: 32, 32>}, {pipeline_mode = #tpu.pipeline_mode<synchronous>, transform_indices = @transform_6, window_bounds = array<i64: 1, 32>}, {transform_indices = @transform_7, window_bounds = array<i64: 16, 32>}, {transform_indices = @transform_8, window_bounds = array<i64: 16, 32>}, {transform_indices = @transform_9, window_bounds = array<i64: 16, 32>}]} {
    %c0 = arith.constant 0 : index
    %c0_0 = arith.constant 0 : index
    %0 = vector.load %arg1[%c0, %c0_0] : memref<16x32xbf16, #tpu.memory_space<vmem>>, vector<16x32xbf16>
    %c0_1 = arith.constant 0 : index
    %c0_2 = arith.constant 0 : index
    %1 = vector.load %arg2[%c0_1, %c0_2] : memref<32x32xbf16, #tpu.memory_space<vmem>>, vector<32x32xbf16>
    %cst = arith.constant dense<0.000000e+00> : vector<16x32xf32>
    %2 = tpu.matmul %0, %1, %cst {dimension_numbers = #tpu.dot_dimension_numbers<[1], [0], [0], [1], [0, 0, 1, 1], [], []>} : vector<16x32xbf16>, vector<32x32xbf16>, vector<16x32xf32> -> vector<16x32xf32>
    %c0_3 = arith.constant 0 : index
    %c0_4 = arith.constant 0 : index
    %3 = vector.load %arg3[%c0_3, %c0_4] : memref<1x32xf32, #tpu.memory_space<vmem>>, vector<1x32xf32>
    %4 = vector.broadcast %3 : vector<1x32xf32> to vector<16x32xf32>
    %5 = arith.addf %2, %4 : vector<16x32xf32>
    %6 = arith.truncf %5 : vector<16x32xf32> to vector<16x32xbf16>
    %c0_5 = arith.constant 0 : index
    %c0_6 = arith.constant 0 : index
    %7 = vector.load %arg8[%c0_5, %c0_6] : memref<16x32xbf16, #tpu.memory_space<vmem>>, vector<16x32xbf16>
    tpu.vector_store %arg8[%c0_5, %c0_6], %6 {strides = array<i32>} : memref<16x32xbf16, #tpu.memory_space<vmem>>, vector<16x32xbf16>,
    %c0_7 = arith.constant 0 : index
    %c0_8 = arith.constant 0 : index
    %8 = vector.load %arg4[%c0_7, %c0_8] : memref<32x32xbf16, #tpu.memory_space<vmem>>, vector<32x32xbf16>
    %cst_9 = arith.constant dense<0.000000e+00> : vector<16x32xf32>
    %9 = tpu.matmul %0, %8, %cst_9 {dimension_numbers = #tpu.dot_dimension_numbers<[1], [0], [0], [1], [0, 0, 1, 1], [], []>} : vector<16x32xbf16>, vector<32x32xbf16>, vector<16x32xf32> -> vector<16x32xf32>
    %c0_10 = arith.constant 0 : index
    %c0_11 = arith.constant 0 : index
    %10 = vector.load %arg5[%c0_10, %c0_11] : memref<1x32xf32, #tpu.memory_space<vmem>>, vector<1x32xf32>
    %11 = vector.broadcast %10 : vector<1x32xf32> to vector<16x32xf32>
    %12 = arith.addf %9, %11 : vector<16x32xf32>
    %13 = arith.truncf %12 : vector<16x32xf32> to vector<16x32xbf16>
    %c0_12 = arith.constant 0 : index
    %c0_13 = arith.constant 0 : index
    %14 = vector.load %arg9[%c0_12, %c0_13] : memref<16x32xbf16, #tpu.memory_space<vmem>>, vector<16x32xbf16>
    tpu.vector_store %arg9[%c0_12, %c0_13], %13 {strides = array<i32>} : memref<16x32xbf16, #tpu.memory_space<vmem>>, vector<16x32xbf16>,
    %c0_14 = arith.constant 0 : index
    %c0_15 = arith.constant 0 : index
    %15 = vector.load %arg6[%c0_14, %c0_15] : memref<32x32xbf16, #tpu.memory_space<vmem>>, vector<32x32xbf16>
    %cst_16 = arith.constant dense<0.000000e+00> : vector<16x32xf32>
    %16 = tpu.matmul %0, %15, %cst_16 {dimension_numbers = #tpu.dot_dimension_numbers<[1], [0], [0], [1], [0, 0, 1, 1], [], []>} : vector<16x32xbf16>, vector<32x32xbf16>, vector<16x32xf32> -> vector<16x32xf32>
    %c0_17 = arith.constant 0 : index
    %c0_18 = arith.constant 0 : index
    %17 = vector.load %arg7[%c0_17, %c0_18] : memref<1x32xf32, #tpu.memory_space<vmem>>, vector<1x32xf32>
    %18 = vector.broadcast %17 : vector<1x32xf32> to vector<16x32xf32>
    %19 = arith.addf %16, %18 : vector<16x32xf32>
    %20 = arith.truncf %19 : vector<16x32xf32> to vector<16x32xbf16>
    %c0_19 = arith.constant 0 : index
    %c0_20 = arith.constant 0 : index
    %21 = vector.load %arg10[%c0_19, %c0_20] : memref<16x32xbf16, #tpu.memory_space<vmem>>, vector<16x32xbf16>
    tpu.vector_store %arg10[%c0_19, %c0_20], %20 {strides = array<i32>} : memref<16x32xbf16, #tpu.memory_space<vmem>>, vector<16x32xbf16>,
    return
  }
  func.func @transform_0(%arg0: i32) -> (i32, i32) {
    %c0_i32 = arith.constant 0 : i32
    %c0_i32_0 = arith.constant 0 : i32
    return %arg0, %c0_i32 : i32, i32
  }
  func.func @transform_1(%arg0: i32) -> (i32, i32) {
    %c0_i32 = arith.constant 0 : i32
    %c0_i32_0 = arith.constant 0 : i32
    %c0_i32_1 = arith.constant 0 : i32
    return %c0_i32, %c0_i32_0 : i32, i32
  }
  func.func @transform_2(%arg0: i32) -> (i32, i32) {
    %c0_i32 = arith.constant 0 : i32
    %c0_i32_0 = arith.constant 0 : i32
    %c0_i32_1 = arith.constant 0 : i32
    return %c0_i32, %c0_i32_0 : i32, i32
  }
  func.func @transform_3(%arg0: i32) -> (i32, i32) {
    %c0_i32 = arith.constant 0 : i32
    %c0_i32_0 = arith.constant 0 : i32
    %c0_i32_1 = arith.constant 0 : i32
    return %c0_i32, %c0_i32_0 : i32, i32
  }
  func.func @transform_4(%arg0: i32) -> (i32, i32) {
    %c0_i32 = arith.constant 0 : i32
    %c0_i32_0 = arith.constant 0 : i32
    %c0_i32_1 = arith.constant 0 : i32
    return %c0_i32, %c0_i32_0 : i32, i32
  }
  func.func @transform_5(%arg0: i32) -> (i32, i32) {
    %c0_i32 = arith.constant 0 : i32
    %c0_i32_0 = arith.constant 0 : i32
    %c0_i32_1 = arith.constant 0 : i32
    return %c0_i32, %c0_i32_0 : i32, i32
  }
  func.func @transform_6(%arg0: i32) -> (i32, i32) {
    %c0_i32 = arith.constant 0 : i32
    %c0_i32_0 = arith.constant 0 : i32
    %c0_i32_1 = arith.constant 0 : i32
    return %c0_i32, %c0_i32_0 : i32, i32
  }
  func.func @transform_7(%arg0: i32) -> (i32, i32) {
    %c0_i32 = arith.constant 0 : i32
    %c0_i32_0 = arith.constant 0 : i32
    return %arg0, %c0_i32 : i32, i32
  }
  func.func @transform_8(%arg0: i32) -> (i32, i32) {
    %c0_i32 = arith.constant 0 : i32
    %c0_i32_0 = arith.constant 0 : i32
    return %arg0, %c0_i32 : i32, i32
  }
  func.func @transform_9(%arg0: i32) -> (i32, i32) {
    %c0_i32 = arith.constant 0 : i32
    %c0_i32_0 = arith.constant 0 : i32
    return %arg0, %c0_i32 : i32, i32
  }
}

</mosaic_0001>

<bundles_post_ra>
// kernel: tpu_custom_call.1
= control target key start
LH: loop header
LB: loop body
LE: loop exit
PB: predicated region body
PF: predicated region fallthrough
CT: control target
= control target key end

     0   :  { %s1520_s0 = inlined_call_operand.hbm [shape: bf16[32,32], index: 0, kind: input, shape index: {}]   ;;  %s1521_s1 = inlined_call_operand.hbm [shape: bf16[32,32], index: 1, kind: input, shape index: {}]   ;;  %s1522_s2 = inlined_call_operand.vmem [shape: f32[1,32], index: 2, kind: input, shape index: {}]   ;;  %s1523_s3 = inlined_call_operand.hbm [shape: bf16[32,32], index: 3, kind: input, shape index: {}]   ;;  %s1524_s4 = inlined_call_operand.vmem [shape: f32[1,32], index: 4, kind: input, shape index: {}]   ;;  %s1525_s5 = inlined_call_operand.hbm [shape: bf16[32,32], index: 5, kind: input, shape index: {}]   ;;  %s1526_s6 = inlined_call_operand.vmem [shape: f32[1,32], index: 6, kind: input, shape index: {}]   ;;  %s1527_s7 = inlined_call_operand.hbm [shape: bf16[32,32], index: 7, kind: output, shape index: {0}]   ;;  %s1528_s8 = inlined_call_operand.hbm [shape: bf16[32,32], index: 8, kind: output, shape index: {1}]   ;;  %s1529_s9 = inlined_call_operand.hbm [shape: bf16[32,32], index: 9, kind: output, shape index: {2}]  }
   0x1   :  { %1535 = sst [smem:[#allocation20_spill]] %s1520_s0 }
   0x2   :  { %1536 = sst [smem:[#allocation21_spill]] %s1521_s1 }
   0x3   :  { %1537 = sst [smem:[#allocation22_spill]] %s1522_s2 }
   0x4   :  { %1538 = sst [smem:[#allocation23_spill]] %s1523_s3 }
   0x5   :  { %1539 = sst [smem:[#allocation24_spill]] %s1524_s4 }
   0x6   :  { %1540 = sst [smem:[#allocation25_spill]] %s1525_s5 }
   0x7   :  { %15 = vsyncpa [#allocation3], 0 }
   0x8   :  { %17 = vsyncpa [#allocation3 + $0x1], 0 }
   0x9   :  { %18 = vsyncpa [#allocation6], 0 }
   0xa   :  { %19 = vsyncpa [#allocation9], 0 }
   0xb   :  { %20 = vsyncpa [#allocation4], 0 }
   0xc   :  { %22 = vsyncpa [#allocation4 + $0x1], 0 }
   0xd   :  { %23 = vsyncpa [#allocation12], 0 }
   0xe   :  { %25 = vsyncpa [#allocation12 + $0x1], 0  ;;  %s1254_s30 = smov 0   ;;  %s1256_s10 = smov 0  }
   0xf   :  { %s1258_s11 = smov 0   ;;  %s1260_s12 = smov 0  }
  0x10 LB: > { %s1275_s13 = sadd.s32 4294967295, %s1195_s12   ;;  %s1530_s14 = sadd.s32 4294967294, %s1195_s12   ;;  %s1195_s12 = sphi %s1260_s12, %s1565_s12   ;;  %s1191_s11 = sphi %s1258_s11, %s1564_s11   ;;  %s1187_s10 = sphi %s1256_s10, %s1563_s10   ;;  %s1183_s30 = sphi %s1254_s30, %s1562_s30  }
  0x11   : > { %p51_p0 = scmp.ne.s32.totalorder %s1187_s10, %s1183_s30  ;;  %p52_p1 = scmp.eq.s32.totalorder %s1275_s13, 0 }
  0x12   : > { %p201_p2 = scmp.eq.s32.totalorder %s1275_s13, 1  ;;  %p207_p3 = scmp.eq.s32.totalorder %s1530_s14, 1 }
  0x13   : > { %p1286_p4 = por %p52_p1, %p51_p0  ;;  %p778_p5 = scmp.ge.s32.totalorder %s1195_s12, 1 }
  0x14   : > { %p1291_p6 = por %p207_p3, %p51_p0  ;;  %p266_p7 = scmp.lt.s32.totalorder %s1195_s12, 3 }
  0x15   : > { %s1543_s1 = sld [smem:[#allocation21_spill]]  ;;  %s1197_s21 = smov [#allocation5]  }
  0x16   : > { %p1299_p8 = pnand %p778_p5, %p266_p7  ;;  %s279_s22 = sshll.u32 %s1197_s21, 4  ;;  %s280_s22 = int_to_ptr.vmem [resolvable:$true] %s279_s22 }
  0x17   : > { %s1546_s3 = sld [smem:[#allocation23_spill]]  ;;  %s1531_s27 = smov 64  }
  0x18   : > { %p867_p9 = pneg %p1299_p8  ;;  %s1532_s28 = smov 4  }
  0x19   : > { %s1200_s29 = smov [#allocation7]   ;;  %s1547_s5 = sld [smem:[#allocation25_spill]] }
  0x1a   : > { %p1307_p10 = pnand %p867_p9, %p52_p1  ;;  %s296_s17 = sshll.u32 %s1200_s29, 4  ;;  %s297_s17 = int_to_ptr.vmem [resolvable:$true] %s296_s17 }
  0x1b   : > { %s277_s19 = sshll.u32 %s1543_s1, 4  ;;  %s1329_s25 = sadd.s32 1, %s1195_s12   ;;  %s278_s19 = int_to_ptr.hbm [resolvable:$true] %s277_s19 }
  0x1c   : > { %870 = dma.hbm_to_vmem [thread:$0]  (!%p1307_p10), %s278_s19, 256, %s280_s22, [#allocation6], %s1531_s27, %s1531_s27, %s1532_s28  }
  0x1d   : > { %s294_s26 = sshll.u32 %s1546_s3, 4  ;;  %s1201_s19 = smov [#allocation8]   ;;  %s295_s26 = int_to_ptr.hbm [resolvable:$true] %s294_s26 }
  0x1e   : > { %873 = dma.hbm_to_vmem [thread:$0]  (!%p1307_p10), %s295_s26, 256, %s297_s17, [#allocation6], %s1531_s27, %s1531_s27, %s1532_s28  }
  0x1f   : > { %s311_s24 = sshll.u32 %s1547_s5, 4  ;;  %s313_s22 = sshll.u32 %s1201_s19, 4  ;;  %s312_s24 = int_to_ptr.hbm [resolvable:$true] %s311_s24  ;;  %s314_s22 = int_to_ptr.vmem [resolvable:$true] %s313_s22 }
  0x20   : > { %876 = dma.hbm_to_vmem [thread:$0]  (!%p1307_p10), %s312_s24, 256, %s314_s22, [#allocation9], %s1531_s27, %s1531_s27, %s1532_s28  }
  0x21   : > { %s35_s29 = ssub.s32 %s1195_s12, %s1329_s25  ;;  %s38_s18 = sadd.s32 1, %s1191_s11 }
  0x22   : > { %p36_p12 = scmp.eq.s32.totalorder %s35_s29, 0  ;;  %p45_p13 = scmp.ne.s32.totalorder %s1191_s11, %s1187_s10 }
  0x23   : > { %p46_p0 = scmp.eq.s32.totalorder %s1195_s12, 0  ;;  %p894_p5 = scmp.lt.s32.totalorder %s1195_s12, 2 }
  0x24   : > { %s1343_s21 = scalar_select %p36_p12, %s1191_s11, %s38_s18  }
  0x25   : > { %p1347_p3 = por %p201_p2, %p45_p13  ;;  %s330_s17 = sand.u32 1, %s1191_s11  }
  0x26   : > { %s836_s23 = sshll.u32 %s1195_s12, 3  ;;  %p47_p7 = por %p46_p0, %p45_p13 }
  0x27   : > { %s783_s19 = sshll.u32 %s330_s17, 3  ;;  %s1549_s0 = sld [smem:[#allocation20_spill]] }
  0x28   : > { %s334_s29 = scalar_lea.vmem [#allocation2], %s783_s19  ;;  %p1357_p9 = pnand %p894_p5, %p47_p7 }
  0x29   : > { %s342_s27 = sshll.u32 %s334_s29, 4  ;;  %s331_s28 = scalar_lea.sflag [#allocation3], %s330_s17  ;;  %s343_s27 = int_to_ptr.vmem [resolvable:$true] %s342_s27 }
  0x2a   : > { %p1035_p10 = pneg %p1357_p9 }
  0x2d   : > { %s339_s24 = scalar_lea.hbm %s1549_s0, %s836_s23  ;;  %s1038_s23 = scalar_lea.hbm %s1549_s0, 16 }
  0x2e   : > { %s340_s22 = sshll.u32 %s339_s24, 4  ;;  %s341_s22 = int_to_ptr.hbm [resolvable:$true] %s340_s22 }
  0x2f   : > { %s1031_s3 = sshra.s32 %s341_s22, 4  ;;  %s1032_s3 = int_to_ptr.hbm [resolvable:$true] %s1031_s3 }
  0x30   : > { %s1033_s5 = scalar_lea.hbm %s1032_s3, 8  ;;  %p1039_p0 = scmp.lt.s32.totalorder %s1032_s3, %s1549_s0 }
  0x31   : > { %p1034_p2 = scmp.ne.s32.totalorder %s1032_s3, %s1033_s5  ;;  %p1040_p5 = scmp.lt.s32.totalorder %s1038_s23, %s1033_s5 }
  0x33   : > { %p1036_p12 = pnand %p1035_p10, %p1034_p2  ;;  %p1041_p7 = por %p1040_p5, %p1039_p0 }
  0x35   : > { %p1037_p13 = pneg %p1036_p12 }
  0x37   : > { %p1042_p11 = pnand %p1041_p7, %p1037_p13 }
  0x39   : > { %1045 = shalt.err (!%p1042_p11)
}
  0x3a   : > { %s1551_s17 = smov 4   ;;  %s1552_s29 = smov 64  }
  0x3b   : > { %880 = dma.hbm_to_vmem [thread:$0]  (!%p1357_p9), %s341_s22, 128, %s343_s27, %s331_s28, %s1552_s29, %s1552_s29, %s1551_s17  }
  0x3c   : > { %354 = sbr.rel (%p1299_p8) target bundleno = 255 (0xff), region = 48 }
  0x41   : > { %s1377_s1 = sand.u32 1, %s1187_s10  }
  0x42   : > { %s1380_s3 = sshll.u32 %s1377_s1, 3  ;;  %s357_s5 = scalar_lea.sflag [#allocation3], %s1377_s1 }
  0x43   : > { %s360_s14 = scalar_lea.vmem [#allocation2], %s1380_s3 }
  0x44   : > { %1162 = dma.done.wait (%p1286_p4), %s357_s5, 128  }
  0x45   : > { %1164 = vsyncadd (%p1286_p4), %s357_s5, 4294967168 }
  0x46   : > { %1166 = dma.done.wait (%p52_p1), [#allocation6], 512  }
  0x47   : > { %1168 = vsyncadd (%p52_p1), [#allocation6], 4294966784 }
  0x48   : > { %1170 = dma.done.wait (%p52_p1), [#allocation9], 256  }
  0x49   : > { %1172 = vsyncadd (%p52_p1), [#allocation9], 4294967040  ;;  %v839_v0 = vld [vmem:[#allocation5 + $0x8] sm:$0xff]  ;;  %v841_v1 = vld [vmem:[#allocation7 + $0x8] sm:$0xff]  ;;  %vm453_vm0 = vcmask 261120   ;;  %s1553_s2 = sld [smem:[#allocation22_spill]] }
  0x4a   : > { %v843_v2 = vld [vmem:[#allocation8 + $0x8] sm:$0xff]  ;;  %463 = vmatpush.bf16.msra.mxu0 %v839_v0  ;;  %502 = vmatpush.bf16.msra.mxu1 %v841_v1  ;;  %v838_v3 = vld [vmem:[#allocation5] sm:$0xff]  ;;  %v840_v4 = vld [vmem:[#allocation7] sm:$0xff]  ;;  %s1554_s4 = sld [smem:[#allocation24_spill]]  ;;  %vm473_vm1 = vcmask 257024   ;;  %s1403_s22 = sshll.u32 %s1275_s13, 3 }
  0x4b   : > { %540 = vmatpush.bf16.msra.mxu2 %v843_v2  ;;  %v842_v5 = vld [vmem:[#allocation8] sm:$0xff]  ;;  %v837_v6 = vld [vmem:[%s360_s14] sm:$0xff]  ;;  %s406_s19 = scalar_lea.vmem [#allocation10], %s1380_s3  ;;  %s591_s29 = scalar_lea.hbm %s1528_s8, %s1403_s22 }
  0x4c   : > { %v940_v15 = vld [vmem:[%s1526_s6] ss:$0 sm:$0xff]  ;;  %s575_s5 = sshll.u32 %s406_s19, 4  ;;  %s413_s14 = scalar_lea.vmem [#allocation11], %s1380_s3  ;;  %s1438_s5 = int_to_ptr.vmem [resolvable:$true] %s575_s5 }
  0x4d   : > { %s557_s15 = sand.u32 1, %s1275_s13   ;;  %s592_s20 = sshll.u32 %s413_s14, 4  ;;  %s1425_s20 = int_to_ptr.vmem [resolvable:$true] %s592_s20 }
  0x4e   : > { %464 = vmatpush.bf16.msra.mxu0 %v838_v3  ;;  %503 = vmatpush.bf16.msra.mxu1 %v840_v4  ;;  %s574_s18 = scalar_lea.hbm %s1527_s7, %s1403_s22  ;;  %s1421_s23 = sshll.u32 %s591_s29, 4  ;;  %s595_s23 = int_to_ptr.hbm [resolvable:$true] %s1421_s23 }
  0x4f   : > { %541 = vmatpush.bf16.msra.mxu2 %v842_v5  ;;  %v938_v7 = vld [vmem:[%s1553_s2] ss:$0 sm:$0xff]  ;;  %s1423_s24 = sshll.u32 %s574_s18, 4  ;;  %s608_s27 = scalar_lea.hbm %s1529_s9, %s1403_s22 }
  0x50   : > { %v939_v8 = vld [vmem:[%s1554_s4] ss:$0 sm:$0xff]  ;;  %1555 = sst [smem:[#allocation19_spill]] %s1423_s24  ;;  %s1432_s28 = scalar_lea.vmem [#allocation13], %s1380_s3 }
  0x51   : > { %806 = vmatmul.msk.bf16.vlgmr.msra.gmra.mxu0 %vm453_vm0, %v837_v6  ;;  %815 = vmatmul.msk.bf16.vlgmr.msra.gmra.mxu1 %vm453_vm0, %v837_v6  ;;  %s1443_s18 = sshll.u32 %s608_s27, 4  ;;  %s1445_s22 = scalar_lea.sflag [#allocation12], %s557_s15  ;;  %s612_s18 = int_to_ptr.hbm [resolvable:$true] %s1443_s18 }
  0x52   : > { %824 = vmatmul.msk.bf16.vlgmr.msra.gmra.mxu2 %vm453_vm0, %v837_v6  ;;  %s1075_s3 = sshra.s32 %s595_s23, 4  ;;  %s1081_s0 = scalar_lea.hbm %s1528_s8, 16  ;;  %s1076_s3 = int_to_ptr.hbm [resolvable:$true] %s1075_s3 }
  0x53   : > { %s1077_s13 = scalar_lea.hbm %s1076_s3, 8  ;;  %p1082_p11 = scmp.lt.s32.totalorder %s1076_s3, %s1528_s8 }
  0x54   : > { %p1078_p1 = scmp.ne.s32.totalorder %s1076_s3, %s1077_s13  ;;  %p1083_p9 = scmp.lt.s32.totalorder %s1081_s0, %s1077_s13 }
  0x56   : > { %p1079_p4 = pnand %p1078_p1, %p1347_p3  ;;  %p1084_p2 = por %p1083_p9, %p1082_p11 }
  0x58   : > { %p1080_p8 = pneg %p1079_p4 }
  0x5a   : > { %p1085_p10 = pnand %p1084_p2, %p1080_p8 }
  0xce   : > { %v466_v9 = vpop.f32.mrf.mxu0  ;;  %v505_v10 = vpop.f32.mrf.mxu1 }
  0xcf   : > { %v467_v11 = vadd.f32 %v938_v7, %v466_v9  ;;  %v506_v12 = vadd.f32 %v939_v8, %v505_v10 }
  0xd1   : > { %v471_v13 = vpack.c.bf16 %v467_v11, %v467_v11  ;;  %v510_v14 = vpack.c.bf16 %v506_v12, %v506_v12 }
  0xd3   : > { %474 = vst.msk [vmem:[%s406_s19] sm:$0xf] %vm473_vm1, %v471_v13 }
  0xd4   : > { %512 = vst.msk [vmem:[%s413_s14] sm:$0xf] %vm473_vm1, %v510_v14 }
  0xd5   : > { %v543_v16 = vpop.f32.mrf.mxu2 }
  0xd6   : > { %v544_v17 = vadd.f32 %v940_v15, %v543_v16  ;;  %v468_v18 = vpop.f32.mrf.mxu0  ;;  %v507_v19 = vpop.f32.mrf.mxu1 }
  0xd7   : > { %v469_v20 = vadd.f32 %v938_v7, %v468_v18  ;;  %v508_v21 = vadd.f32 %v939_v8, %v507_v19 }
  0xd8   : > { %v548_v22 = vpack.c.bf16 %v544_v17, %v544_v17 }
  0xd9   : > { %v472_v23 = vpack.c.bf16 %v469_v20, %v469_v20  ;;  %v511_v24 = vpack.c.bf16 %v508_v21, %v508_v21 }
  0xda   : > { %550 = vst.msk [vmem:[%s1432_s28] sm:$0xf] %vm473_vm1, %v548_v22 }
  0xdb   : > { %475 = vst.msk [vmem:[%s406_s19 + $0x4] sm:$0xf] %vm473_vm1, %v472_v23 }
  0xdc   : > { %513 = vst.msk [vmem:[%s413_s14 + $0x4] sm:$0xf] %vm473_vm1, %v511_v24 }
  0xdd   : > { %v545_v25 = vpop.f32.mrf.mxu2 }
  0xde   : > { %1088 = shalt.err (!%p1085_p10)
}
  0xdf   : > { %s1202_s14 = smov 64   ;;  %s1556_s15 = sld [smem:[#allocation19_spill]]  ;;  %v546_v26 = vadd.f32 %v940_v15, %v545_v25 }
  0xe0   : > { %s1203_s27 = smov 4   ;;  %s553_s24 = scalar_lea.sflag [#allocation4], %s1377_s1 }
  0xe1   : > { %862 = dma.vmem_to_hbm [thread:$0]  (%p1347_p3), %s1425_s20, 128, %s595_s23, %s1445_s22, %s1202_s14, %s1202_s14, %s1203_s27  }
  0xe2   : > { %s1109_s19 = scalar_lea.hbm %s1527_s7, 16 }
  0xe5   : > { %s1557_s29 = int_to_ptr.hbm [resolvable:$true] %s1556_s15 }
  0xe6   : > { %s1103_s0 = sshra.s32 %s1557_s29, 4  ;;  %s1104_s0 = int_to_ptr.hbm [resolvable:$true] %s1103_s0 }
  0xe7   : > { %s1105_s3 = scalar_lea.hbm %s1104_s0, 8  ;;  %p1110_p5 = scmp.lt.s32.totalorder %s1104_s0, %s1527_s7 }
  0xe8   : > { %p1106_p12 = scmp.ne.s32.totalorder %s1104_s0, %s1105_s3  ;;  %p1111_p7 = scmp.lt.s32.totalorder %s1109_s19, %s1105_s3 }
  0xea   : > { %p1107_p13 = pnand %p1106_p12, %p1347_p3  ;;  %p1112_p1 = por %p1111_p7, %p1110_p5 }
  0xec   : > { %p1108_p0 = pneg %p1107_p13 }
  0xee   : > { %p1113_p4 = pnand %p1112_p1, %p1108_p0 }
  0xf0   : > { %1116 = shalt.err (!%p1113_p4)
}
  0xf1   : > { %s1558_s1 = smov %s1557_s29  ;;  %s1559_s20 = sshll.u32 %s1432_s28, 4  ;;  %v549_v27 = vpack.c.bf16 %v546_v26, %v546_v26  ;;  %s610_s20 = int_to_ptr.vmem [resolvable:$true] %s1559_s20 }
  0xf2   : > { %861 = dma.vmem_to_hbm [thread:$0]  (%p1347_p3), %s1438_s5, 128, %s1558_s1, %s553_s24, %s1202_s14, %s1202_s14, %s1203_s27  }
  0xf3   : > { %551 = vst.msk [vmem:[%s1432_s28 + $0x4] sm:$0xf] %vm473_vm1, %v549_v27  ;;  %s1131_s2 = sshra.s32 %s612_s18, 4  ;;  %s1137_s29 = scalar_lea.hbm %s1529_s9, 16  ;;  %s1132_s2 = int_to_ptr.hbm [resolvable:$true] %s1131_s2 }
  0xf4   : > { %s1133_s4 = scalar_lea.hbm %s1132_s2, 8  ;;  %p1138_p2 = scmp.lt.s32.totalorder %s1132_s2, %s1529_s9 }
  0xf5   : > { %p1134_p8 = scmp.ne.s32.totalorder %s1132_s2, %s1133_s4  ;;  %p1139_p10 = scmp.lt.s32.totalorder %s1137_s29, %s1133_s4 }
  0xf7   : > { %p1135_p11 = pnand %p1134_p8, %p1347_p3  ;;  %p1140_p12 = por %p1139_p10, %p1138_p2 }
  0xf9   : > { %p1136_p9 = pneg %p1135_p11 }
  0xfb   : > { %p1141_p13 = pnand %p1140_p12, %p1136_p9 }
  0xfd   : > { %1144 = shalt.err (!%p1141_p13)
}
  0xfe   : > { %863 = dma.vmem_to_hbm [thread:$0]  (%p1347_p3), %s610_s20, 128, %s612_s18, %s1445_s22, %s1202_s14, %s1202_s14, %s1203_s27  }
  0xff PF: > { %s626_s5 = sand.u32 1, %s1183_s30   ;;  %p1560_p0 = scmp.ge.s32.totalorder %s1195_s12, 2 }
 0x100   : > { %s627_s28 = scalar_lea.sflag [#allocation4], %s626_s5 }
 0x101   : > { %p882_p5 = pnand %p1560_p0, %p1291_p6 }
 0x103   : > { %p883_p7 = pneg %p882_p5 }
 0x105   : > { %1174 = dma.done.wait (%p883_p7), %s627_s28, 128  }
 0x106   : > { %1176 = vsyncadd (%p883_p7), %s627_s28, 4294967168  ;;  %s1561_s24 = sadd.s32 4294967294, %s1195_s12  }
 0x107   : > { %s636_s26 = sand.u32 1, %s1561_s24  }
 0x108   : > { %s637_s13 = scalar_lea.sflag [#allocation12], %s636_s26 }
 0x109   : > { %1178 = dma.done.wait (%p883_p7), %s637_s13, 256  }
 0x10a   : > { %1180 = vsyncadd (%p883_p7), %s637_s13, 4294967040  ;;  %p28_p3 = scmp.ge.s32.totalorder %s1329_s25, 4   ;;  %s1562_s30 = smov %s1187_s10 }
 0x10b   : > { %s1563_s10 = smov %s1191_s11  ;;  %s1564_s11 = smov %s1343_s21 }
 0x10c   : > { %s1565_s12 = smov %s1329_s25  ;;  %30 = sbr.rel (!%p28_p3) target bundleno = 16 (0x10), region = 137 }
 0x111   :  { %653 = vsyncpa [#allocation3], 1 }
 0x112   :  { %655 = vsyncpa [#allocation3 + $0x1], 1 }
 0x113   :  { %656 = vsyncpa [#allocation6], 1 }
 0x114   :  { %657 = vsyncpa [#allocation9], 1 }
 0x115   :  { %658 = vsyncpa [#allocation4], 1 }
 0x116   :  { %660 = vsyncpa [#allocation4 + $0x1], 1 }
 0x117   :  { %661 = vsyncpa [#allocation12], 1 }
 0x118   :  { %663 = vsyncpa [#allocation12 + $0x1], 1 }

</bundles_post_ra>
